<compile_context>
chip_gen: v7x
topology: tpu7x:2x2x1
jax: 0.10.0
libtpu: 0.0.40
codegen_flags: <defaults>
</compile_context>

<pallas_src>
import functools

import jax
import jax.numpy as jnp
from jax.experimental import pallas as pl
from jax.experimental.pallas import tpu as pltpu


# ----------------------------------------------------------------------------
# One-time probe: which way does pltpu.roll rotate?  (+1: roll(x,s)[i]=x[i+s],
# -1: jnp.roll convention roll(x,s)[i]=x[i-s], 0: unknown/unavailable.)
# Cached; runs a tiny kernel once per process so the max-tree extraction never
# depends on an assumed rotate direction.
# ----------------------------------------------------------------------------
@functools.lru_cache(maxsize=None)
def _pltpu_roll_direction() -> int:
    try:
        def k(x_ref, o_ref):
            o_ref[...] = pltpu.roll(x_ref[...], shift=1, axis=1)

        x = jnp.tile(jnp.arange(128, dtype=jnp.float32)[None, :], (8, 1))
        out = pl.pallas_call(
            k, out_shape=jax.ShapeDtypeStruct((8, 128), jnp.float32))(x)
        v = float(out[0, 0])
        if v == 1.0:
            return 1
        if v == 127.0:
            return -1
        return 0
    except Exception:
        return 0


# ----------------------------------------------------------------------------
# Kernel.  Grid = (N blocks [parallel], C blocks [arbitrary / reduction, last]).
# ----------------------------------------------------------------------------
def _height_attn_kernel(x_ref, w1s_ref, w1m_ref, w2t_ref, out_ref,
                        sum_ref, max_ref, *,
                        sub, n_groups, width, height, use_tree, leader_off):
    c = pl.program_id(1)

    # ---- init running accumulators at the first C step ----------------------
    @pl.when(c == 0)
    def _init():
        sum_ref[...] = jnp.zeros(sum_ref.shape, sum_ref.dtype)
        max_ref[...] = jnp.full(max_ref.shape, -jnp.inf, max_ref.dtype)

    # ---- streaming phase: pure VPU accumulate (no cross-lane/sublane work) ---
    # x block: (n_blk, c_blk, HW), lane-dense minor dim.  c_blk is consumed as
    # n_groups sublane-aligned slices of `sub` rows each, so the per-step
    # reduction is whole-vreg adds / maxes into (n_blk, sub, HW) accumulators.
    x = x_ref[...]
    ps = x[:, 0:sub, :].astype(sum_ref.dtype)
    pm = x[:, 0:sub, :].astype(max_ref.dtype)
    for g in range(1, n_groups):
        xg = x[:, g * sub:(g + 1) * sub, :]
        ps = ps + xg.astype(sum_ref.dtype)
        pm = jnp.maximum(pm, xg.astype(max_ref.dtype))
    sum_ref[...] += ps
    max_ref[...] = jnp.maximum(max_ref[...], pm)

    # ---- finalize: collapse accumulators, HW->H reduce, folded MLP, sigmoid --
    @pl.when(c == pl.num_programs(1) - 1)
    def _finalize():
        n_blk = out_ref.shape[0]
        hw = sum_ref.shape[-1]

        s_flat = jnp.sum(sum_ref[...], axis=1)                      # (n_blk, HW) f32
        m_flat = jnp.max(max_ref[...], axis=1).astype(jnp.float32)  # (n_blk, HW)

        col = jax.lax.broadcasted_iota(jnp.int32, (n_blk, hw), 1)
        if use_tree:
            # log2(W) XLU rotations; every group's max ends up on its leader
            # lane (h*W + leader_off, chosen to match the probed roll direction).
            m_work = m_flat
            off = 1
            while off < width:
                m_work = jnp.maximum(m_work,
                                     pltpu.roll(m_work, shift=off, axis=1))
                off *= 2
            m_lead = jnp.where((col & (width - 1)) == leader_off, m_work, 0.0)
        else:
            # Generic-W fallback (finalize-only): H masked lane reduces,
            # scattered onto the leader lanes so the same folded weight applies.
            m_lead = jnp.zeros((n_blk, hw), jnp.float32)
            for h in range(height):
                in_grp = (col >= h * width) & (col < (h + 1) * width)
                m_h = jnp.max(jnp.where(in_grp, m_flat, -jnp.inf),
                              axis=-1, keepdims=True)
                m_lead = jnp.where(col == h * width + leader_off, m_h, m_lead)

        # Shared bias-free MLP with the HW->H segment mean / extraction folded
        # into the first-layer weights (exact, done before the ReLU), so each
        # path is a single (n_blk, HW) @ (HW, hidden) MXU pass.
        hid = (jnp.maximum(jnp.dot(s_flat, w1s_ref[...],
                                   preferred_element_type=jnp.float32), 0.0)
               + jnp.maximum(jnp.dot(m_lead, w1m_ref[...],
                                     preferred_element_type=jnp.float32), 0.0))
        out = jax.nn.sigmoid(jnp.dot(hid, w2t_ref[...],
                                     preferred_element_type=jnp.float32))
        out_ref[...] = out.astype(out_ref.dtype)


# ----------------------------------------------------------------------------
# Wrapper.
# ----------------------------------------------------------------------------
def height_spatial_attention_fc(x, w1, w2, *, n_blk=None, c_blk=None,
                                tile_budget_bytes=8 * 1024 * 1024,
                                vmem_limit_bytes=None):
    """Forward pass of HeightSpatialAttentionFC.

    x : (N, C, H, W)   NCHW, like the PyTorch module.
    w1: (hidden, H)    == nn.Linear(H, hidden, bias=False).weight
    w2: (H, hidden)    == nn.Linear(hidden, H, bias=False).weight
    returns (N, 1, H, 1), matching the PyTorch keepdim output.

    tile_budget_bytes: per-step streamed x tile (review guidance: ~8-16 MiB on
    v5e/v6e, ~8-12 MiB on v7x).  vmem_limit_bytes defaults to the actual
    buffer+scratch need with 25% slack.
    """
    N, C, H, W = x.shape
    hidden = w1.shape[0]
    assert w1.shape == (hidden, H) and w2.shape == (H, hidden)
    HW = H * W
    itemsize = x.dtype.itemsize

    # ---- N blocking (parallel axis; shards across TensorCores on v7x) -------
    if n_blk is None:
        n_blk = 8 if (N % 8 == 0 and N > 8) else N
        # TODO(synk): for N <= 8 (or 8 not dividing N) the parallel axis has
        # extent 1 so one v7x TensorCore idles; fixing it needs N padding or a
        # two-phase HW-parallel reduction, both costing more HBM traffic here.
    assert N % n_blk == 0 and (n_blk == N or n_blk % 8 == 0)

    # ---- C blocking (streamed reduction axis, last grid axis) ---------------
    if c_blk is None:
        per_c_row = n_blk * HW * itemsize
        max_c = max(1, tile_budget_bytes // per_c_row)
        if C <= max_c or C % 8 != 0:
            c_blk = C       # full C (only legal choice when 8 does not divide C)
        else:
            fitting = [d for d in range(8, C + 1, 8) if C % d == 0 and d <= max_c]
            c_blk = max(fitting) if fitting else 8
    assert C % c_blk == 0 and (c_blk == C or c_blk % 8 == 0)

    n_c_steps = C // c_blk
    grid = (N // n_blk, n_c_steps)

    # Sublane-partial accumulators: per-step C reduction stays whole-vreg VPU.
    sub = 8 if c_blk % 8 == 0 else c_blk
    n_groups = c_blk // sub

    # Max path is exact in the input dtype -> keep bf16 accumulators for bf16 x.
    max_dtype = jnp.bfloat16 if x.dtype == jnp.bfloat16 else jnp.float32

    # ---- max-path reduction strategy (roll tree vs generic fallback) --------
    use_tree = (W & (W - 1)) == 0           # power-of-two W
    leader_off = 0
    if use_tree and W > 1:
        d = _pltpu_roll_direction()
        if d == 1:
            leader_off = 0
        elif d == -1:
            leader_off = W - 1
        else:
            use_tree = False                # unknown direction -> safe fallback

    # ---- fold the HW->H segment ops into the first FC layer (exact) ---------
    w1t = jnp.asarray(w1, dtype=jnp.float32).T                 # (H, hidden)
    w2t = jnp.asarray(w2, dtype=jnp.float32).T                 # (hidden, H)
    inv_cw = 1.0 / float(C * W)
    w1_sum = jnp.repeat(w1t, W, axis=0) * inv_cw               # (HW, hidden)
    w1_max = jnp.zeros((HW, hidden), jnp.float32).at[leader_off::W].set(w1t)

    # ---- VMEM sizing ---------------------------------------------------------
    n_bufs = 3 if n_c_steps >= 3 else 2     # 3-deep buffering of the x stream
    x_tile = n_blk * c_blk * HW * itemsize
    scratch = n_blk * sub * HW * (4 + jnp.dtype(max_dtype).itemsize)
    weights = (2 * HW * hidden + hidden * H) * 4 * 2
    out_b = n_blk * H * itemsize * 2
    need = n_bufs * x_tile + scratch + weights + out_b
    if vmem_limit_bytes is None:
        if need > 96 * 1024 * 1024:
            raise ValueError(
                "height_spatial_attention_fc: required VMEM (%d bytes) exceeds "
                "what any TPU generation can hold; reduce n_blk/c_blk or pad C "
                "to a multiple of 8 so it can be tiled." % need)
        vmem_limit_bytes = max(int(need * 1.25) + (2 << 20), 20 << 20)

    # Free layout change: merge the trailing contiguous dims so the streamed
    # tile is lane-dense (minor dim H*W instead of W).  No HBM copy.
    x_flat = x.reshape(N, C, HW)

    # Streamed-x BlockSpec; 3-deep buffering when there are enough C steps.
    if n_bufs == 3:
        try:
            x_spec = pl.BlockSpec((n_blk, c_blk, HW), lambda n, c: (n, c, 0),
                                  pipeline_mode=pl.Buffered(3))
        except Exception:   # older jax without pipeline_mode / Buffered
            x_spec = pl.BlockSpec((n_blk, c_blk, HW), lambda n, c: (n, c, 0))
    else:
        x_spec = pl.BlockSpec((n_blk, c_blk, HW), lambda n, c: (n, c, 0))

    kernel = functools.partial(
        _height_attn_kernel, sub=sub, n_groups=n_groups, width=W, height=H,
        use_tree=use_tree, leader_off=leader_off)

    flops = 2 * N * C * HW + 4 * N * HW * hidden + 2 * N * hidden * H
    bytes_accessed = (x_flat.size * itemsize
                      + (w1_sum.size + w1_max.size + w2t.size) * 4
                      + N * H * itemsize)

    out_nh = pl.pallas_call(
        kernel,
        out_shape=jax.ShapeDtypeStruct((N, H), x.dtype),
        grid=grid,
        in_specs=[
            x_spec,
            pl.BlockSpec((HW, hidden), lambda n, c: (0, 0)),
            pl.BlockSpec((HW, hidden), lambda n, c: (0, 0)),
            pl.BlockSpec((hidden, H), lambda n, c: (0, 0)),
        ],
        out_specs=pl.BlockSpec((n_blk, H), lambda n, c: (n, 0)),
        scratch_shapes=[
            pltpu.VMEM((n_blk, sub, HW), jnp.float32),   # running sum over C
            pltpu.VMEM((n_blk, sub, HW), max_dtype),     # running max over C
        ],
        compiler_params=pltpu.CompilerParams(
            dimension_semantics=("parallel", "arbitrary"),
            vmem_limit_bytes=int(vmem_limit_bytes),
        ),
        cost_estimate=pl.CostEstimate(
            flops=flops, transcendentals=2 * N * H,
            bytes_accessed=bytes_accessed),
    )(x_flat, w1_sum, w1_max, w2t)

    # Glue back to the PyTorch (N, 1, H, 1) keepdim layout.
    return out_nh[:, None, :, None]


# ----------------------------------------------------------------------------
# Pure-JAX reference + tests.
# ----------------------------------------------------------------------------
def _reference(x, w1, w2):
    xf = x.astype(jnp.float32)
    avg = jnp.mean(xf, axis=(1, 3))
    mx = jnp.max(xf, axis=(1, 3))

    def fc(v):
        return jnp.maximum(v @ w1.astype(jnp.float32).T, 0.0) @ w2.astype(jnp.float32).T

    return jax.nn.sigmoid(fc(avg) + fc(mx))[:, None, :, None]


if __name__ == "__main__":
    keys = jax.random.split(jax.random.PRNGKey(0), 8)

    def run_case(idx, N, C, H, W, dtype=jnp.float32, tol=1e-5, **kw):
        hidden = max(H // 16, 1)
        kx, k1, k2 = jax.random.split(keys[idx], 3)
        x = jax.random.normal(kx, (N, C, H, W), dtype=jnp.float32).astype(dtype)
        w1 = jax.random.normal(k1, (hidden, H), dtype=jnp.float32) * 0.1
        w2 = jax.random.normal(k2, (H, hidden), dtype=jnp.float32) * 0.1
        out = jax.block_until_ready(height_spatial_attention_fc(x, w1, w2, **kw))
        ref = _reference(x, w1, w2)
        assert out.shape == (N, 1, H, 1), (idx, out.shape)
        assert jnp.allclose(out.astype(jnp.float32), ref, atol=tol, rtol=tol), (
            "case %d mismatch vs reference" % idx)

    # 1) spec shape (single C step, roll-tree max path)
    run_case(0, 2, 4, 16, 16)
    # 2) multi C-step accumulation (init / accumulate / finalize path)
    run_case(1, 2, 16, 16, 16, c_blk=8)
    # 3) >= 3 C steps -> exercises 3-deep input buffering
    run_case(2, 2, 32, 16, 16, c_blk=8)
    # 4) bf16 input (bf16 max accumulator, multi-group sublane slicing)
    run_case(3, 2, 16, 16, 16, dtype=jnp.bfloat16, tol=2e-2)
    # 5) non-power-of-two W -> generic fallback max path
    run_case(4, 2, 4, 16, 12)
    # 6) N=16 -> n_blk=8 parallel axis (extent 2), hidden=2
    run_case(5, 16, 8, 32, 8)

    print("KERNEL_OK")
</pallas_src>

<mosaic_0001>
module attributes {stable_mosaic.version = 11 : i64} {
  func.func @k(%arg0: memref<8x128xf32, #tpu.memory_space<vmem>>, %arg1: memref<8x128xf32, #tpu.memory_space<vmem>>) attributes {dimension_semantics = [], scalar_prefetch = 0 : i64, scratch_operands = 0 : i64, tpu.core_type = #tpu.core_type<tc>} {
    %c0 = arith.constant 0 : index
    %c0_0 = arith.constant 0 : index
    %0 = vector.load %arg0[%c0, %c0_0] : memref<8x128xf32, #tpu.memory_space<vmem>>, vector<8x128xf32>
    %c1_i32 = arith.constant 1 : i32
    %1 = tpu.dynamic_rotate %0 by %c1_i32 dim 1 : vector<8x128xf32>, i32 -> vector<8x128xf32>
    %c0_1 = arith.constant 0 : index
    %c0_2 = arith.constant 0 : index
    %2 = vector.load %arg1[%c0_1, %c0_2] : memref<8x128xf32, #tpu.memory_space<vmem>>, vector<8x128xf32>
    tpu.vector_store %arg1[%c0_1, %c0_2], %1 {strides = array<i32>} : memref<8x128xf32, #tpu.memory_space<vmem>>, vector<8x128xf32>,
    return
  }
}

module attributes {stable_mosaic.version = 11 : i64} {
  func.func @_height_attn_kernel(%arg0: i32, %arg1: i32, %arg2: memref<2x4x256xf32, #tpu.memory_space<vmem>>, %arg3: memref<256x1xf32, #tpu.memory_space<vmem>>, %arg4: memref<256x1xf32, #tpu.memory_space<vmem>>, %arg5: memref<1x16xf32, #tpu.memory_space<vmem>>, %arg6: memref<2x16xf32, #tpu.memory_space<vmem>>, %arg7: memref<2x4x256xf32, #tpu.memory_space<vmem>>, %arg8: memref<2x4x256xf32, #tpu.memory_space<vmem>>) attributes {dimension_semantics = [#tpu.dimension_semantics<parallel>, #tpu.dimension_semantics<arbitrary>], iteration_bounds = array<i64: 1, 1>, scalar_prefetch = 0 : i64, scratch_operands = 2 : i64, tpu.core_type = #tpu.core_type<tc>, window_params = [{transform_indices = @transform_0, window_bounds = array<i64: 2, 4, 256>}, {pipeline_mode = #tpu.pipeline_mode<synchronous>, transform_indices = @transform_1, window_bounds = array<i64: 256, 1>}, {pipeline_mode = #tpu.pipeline_mode<synchronous>, transform_indices = @transform_2, window_bounds = array<i64: 256, 1>}, {pipeline_mode = #tpu.pipeline_mode<synchronous>, transform_indices = @transform_3, window_bounds = array<i64: 1, 16>}, {transform_indices = @transform_4, window_bounds = array<i64: 2, 16>}]} {
    %c0_i32 = arith.constant 0 : i32
    %0 = arith.cmpi eq, %arg1, %c0_i32 : i32
    %1 = arith.extui %0 : i1 to i32
    %c0_i32_0 = arith.constant 0 : i32
    %2 = arith.cmpi ne, %1, %c0_i32_0 : i32
    scf.if %2 {
      %cst = arith.constant 0.000000e+00 : f32
      %13 = vector.broadcast %cst : f32 to vector<2x4x256xf32>
      %c0_17 = arith.constant 0 : index
      %c0_18 = arith.constant 0 : index
      %c0_19 = arith.constant 0 : index
      %14 = vector.load %arg7[%c0_17, %c0_18, %c0_19] : memref<2x4x256xf32, #tpu.memory_space<vmem>>, vector<2x4x256xf32>
      tpu.vector_store %arg7[%c0_17, %c0_18, %c0_19], %13 {strides = array<i32>} : memref<2x4x256xf32, #tpu.memory_space<vmem>>, vector<2x4x256xf32>,
      %cst_20 = arith.constant 0xFF800000 : f32
      %15 = vector.broadcast %cst_20 : f32 to vector<2x4x256xf32>
      %c0_21 = arith.constant 0 : index
      %c0_22 = arith.constant 0 : index
      %c0_23 = arith.constant 0 : index
      %16 = vector.load %arg8[%c0_21, %c0_22, %c0_23] : memref<2x4x256xf32, #tpu.memory_space<vmem>>, vector<2x4x256xf32>
      tpu.vector_store %arg8[%c0_21, %c0_22, %c0_23], %15 {strides = array<i32>} : memref<2x4x256xf32, #tpu.memory_space<vmem>>, vector<2x4x256xf32>,
    } else {
    }
    %c0 = arith.constant 0 : index
    %c0_1 = arith.constant 0 : index
    %c0_2 = arith.constant 0 : index
    %3 = vector.load %arg2[%c0, %c0_1, %c0_2] : memref<2x4x256xf32, #tpu.memory_space<vmem>>, vector<2x4x256xf32>
    %c0_3 = arith.constant 0 : index
    %c0_4 = arith.constant 0 : index
    %c0_5 = arith.constant 0 : index
    %4 = vector.load %arg7[%c0_3, %c0_4, %c0_5] : memref<2x4x256xf32, #tpu.memory_space<vmem>>, vector<2x4x256xf32>
    %5 = arith.addf %4, %3 : vector<2x4x256xf32>
    %c0_6 = arith.constant 0 : index
    %c0_7 = arith.constant 0 : index
    %c0_8 = arith.constant 0 : index
    %6 = vector.load %arg7[%c0_6, %c0_7, %c0_8] : memref<2x4x256xf32, #tpu.memory_space<vmem>>, vector<2x4x256xf32>
    tpu.vector_store %arg7[%c0_6, %c0_7, %c0_8], %5 {strides = array<i32>} : memref<2x4x256xf32, #tpu.memory_space<vmem>>, vector<2x4x256xf32>,
    %c0_9 = arith.constant 0 : index
    %c0_10 = arith.constant 0 : index
    %c0_11 = arith.constant 0 : index
    %7 = vector.load %arg8[%c0_9, %c0_10, %c0_11] : memref<2x4x256xf32, #tpu.memory_space<vmem>>, vector<2x4x256xf32>
    %8 = arith.maximumf %7, %3 : vector<2x4x256xf32>
    %c0_12 = arith.constant 0 : index
    %c0_13 = arith.constant 0 : index
    %c0_14 = arith.constant 0 : index
    %9 = vector.load %arg8[%c0_12, %c0_13, %c0_14] : memref<2x4x256xf32, #tpu.memory_space<vmem>>, vector<2x4x256xf32>
    tpu.vector_store %arg8[%c0_12, %c0_13, %c0_14], %8 {strides = array<i32>} : memref<2x4x256xf32, #tpu.memory_space<vmem>>, vector<2x4x256xf32>,
    %c0_i32_15 = arith.constant 0 : i32
    %10 = arith.cmpi eq, %arg1, %c0_i32_15 : i32
    %11 = arith.extui %10 : i1 to i32
    %c0_i32_16 = arith.constant 0 : i32
    %12 = arith.cmpi ne, %11, %c0_i32_16 : i32
    scf.if %12 {
      %c0_17 = arith.constant 0 : index
      %c0_18 = arith.constant 0 : index
      %c0_19 = arith.constant 0 : index
      %13 = vector.load %arg7[%c0_17, %c0_18, %c0_19] : memref<2x4x256xf32, #tpu.memory_space<vmem>>, vector<2x4x256xf32>
      %cst = arith.constant dense<0.000000e+00> : vector<2x256xf32>
      %14 = vector.multi_reduction <add>, %13, %cst [1] : vector<2x4x256xf32> to vector<2x256xf32>
      %c0_20 = arith.constant 0 : index
      %c0_21 = arith.constant 0 : index
      %c0_22 = arith.constant 0 : index
      %15 = vector.load %arg8[%c0_20, %c0_21, %c0_22] : memref<2x4x256xf32, #tpu.memory_space<vmem>>, vector<2x4x256xf32>
      %cst_23 = arith.constant dense<0xFF800000> : vector<2x256xf32>
      %16 = vector.multi_reduction <maximumf>, %15, %cst_23 [1] : vector<2x4x256xf32> to vector<2x256xf32>
      %17 = tpu.iota {dimensions = array<i32: 1>} : vector<2x256xi32>
      %cst_24 = arith.constant 0.000000e+00 : f32
      %18 = vector.broadcast %cst_24 : f32 to vector<2x256xf32>
      %c0_i32_25 = arith.constant 0 : i32
      %19 = vector.broadcast %c0_i32_25 : i32 to vector<2x256xi32>
      %20 = arith.cmpi sge, %17, %19 : vector<2x256xi32>
      %c16_i32 = arith.constant 16 : i32
      %21 = vector.broadcast %c16_i32 : i32 to vector<2x256xi32>
      %22 = arith.cmpi slt, %17, %21 : vector<2x256xi32>
      %23 = arith.andi %20, %22 : vector<2x256xi1>
      %cst_26 = arith.constant 0xFF800000 : f32
      %24 = vector.broadcast %cst_26 : f32 to vector<2x256xf32>
      %25 = arith.select %23, %16, %24 : vector<2x256xi1>, vector<2x256xf32>
      %cst_27 = arith.constant dense<0xFF800000> : vector<2xf32>
      %26 = vector.multi_reduction <maximumf>, %25, %cst_27 [1] : vector<2x256xf32> to vector<2xf32>
      %27 = vector.shape_cast %26 : vector<2xf32> to vector<2x1xf32>
      %c0_i32_28 = arith.constant 0 : i32
      %28 = vector.broadcast %c0_i32_28 : i32 to vector<2x256xi32>
      %29 = arith.cmpi eq, %17, %28 : vector<2x256xi32>
      %30 = vector.shape_cast %27 : vector<2x1xf32> to vector<2x1xf32>
      %31 = vector.broadcast %30 : vector<2x1xf32> to vector<2x256xf32>
      %32 = arith.select %29, %31, %18 : vector<2x256xi1>, vector<2x256xf32>
      %c16_i32_29 = arith.constant 16 : i32
      %33 = vector.broadcast %c16_i32_29 : i32 to vector<2x256xi32>
      %34 = arith.cmpi sge, %17, %33 : vector<2x256xi32>
      %c32_i32 = arith.constant 32 : i32
      %35 = vector.broadcast %c32_i32 : i32 to vector<2x256xi32>
      %36 = arith.cmpi slt, %17, %35 : vector<2x256xi32>
      %37 = arith.andi %34, %36 : vector<2x256xi1>
      %cst_30 = arith.constant 0xFF800000 : f32
      %38 = vector.broadcast %cst_30 : f32 to vector<2x256xf32>
      %39 = arith.select %37, %16, %38 : vector<2x256xi1>, vector<2x256xf32>
      %cst_31 = arith.constant dense<0xFF800000> : vector<2xf32>
      %40 = vector.multi_reduction <maximumf>, %39, %cst_31 [1] : vector<2x256xf32> to vector<2xf32>
      %41 = vector.shape_cast %40 : vector<2xf32> to vector<2x1xf32>
      %c16_i32_32 = arith.constant 16 : i32
      %42 = vector.broadcast %c16_i32_32 : i32 to vector<2x256xi32>
      %43 = arith.cmpi eq, %17, %42 : vector<2x256xi32>
      %44 = vector.shape_cast %41 : vector<2x1xf32> to vector<2x1xf32>
      %45 = vector.broadcast %44 : vector<2x1xf32> to vector<2x256xf32>
      %46 = arith.select %43, %45, %32 : vector<2x256xi1>, vector<2x256xf32>
      %c32_i32_33 = arith.constant 32 : i32
      %47 = vector.broadcast %c32_i32_33 : i32 to vector<2x256xi32>
      %48 = arith.cmpi sge, %17, %47 : vector<2x256xi32>
      %c48_i32 = arith.constant 48 : i32
      %49 = vector.broadcast %c48_i32 : i32 to vector<2x256xi32>
      %50 = arith.cmpi slt, %17, %49 : vector<2x256xi32>
      %51 = arith.andi %48, %50 : vector<2x256xi1>
      %cst_34 = arith.constant 0xFF800000 : f32
      %52 = vector.broadcast %cst_34 : f32 to vector<2x256xf32>
      %53 = arith.select %51, %16, %52 : vector<2x256xi1>, vector<2x256xf32>
      %cst_35 = arith.constant dense<0xFF800000> : vector<2xf32>
      %54 = vector.multi_reduction <maximumf>, %53, %cst_35 [1] : vector<2x256xf32> to vector<2xf32>
      %55 = vector.shape_cast %54 : vector<2xf32> to vector<2x1xf32>
      %c32_i32_36 = arith.constant 32 : i32
      %56 = vector.broadcast %c32_i32_36 : i32 to vector<2x256xi32>
      %57 = arith.cmpi eq, %17, %56 : vector<2x256xi32>
      %58 = vector.shape_cast %55 : vector<2x1xf32> to vector<2x1xf32>
      %59 = vector.broadcast %58 : vector<2x1xf32> to vector<2x256xf32>
      %60 = arith.select %57, %59, %46 : vector<2x256xi1>, vector<2x256xf32>
      %c48_i32_37 = arith.constant 48 : i32
      %61 = vector.broadcast %c48_i32_37 : i32 to vector<2x256xi32>
      %62 = arith.cmpi sge, %17, %61 : vector<2x256xi32>
      %c64_i32 = arith.constant 64 : i32
      %63 = vector.broadcast %c64_i32 : i32 to vector<2x256xi32>
      %64 = arith.cmpi slt, %17, %63 : vector<2x256xi32>
      %65 = arith.andi %62, %64 : vector<2x256xi1>
      %cst_38 = arith.constant 0xFF800000 : f32
      %66 = vector.broadcast %cst_38 : f32 to vector<2x256xf32>
      %67 = arith.select %65, %16, %66 : vector<2x256xi1>, vector<2x256xf32>
      %cst_39 = arith.constant dense<0xFF800000> : vector<2xf32>
      %68 = vector.multi_reduction <maximumf>, %67, %cst_39 [1] : vector<2x256xf32> to vector<2xf32>
      %69 = vector.shape_cast %68 : vector<2xf32> to vector<2x1xf32>
      %c48_i32_40 = arith.constant 48 : i32
      %70 = vector.broadcast %c48_i32_40 : i32 to vector<2x256xi32>
      %71 = arith.cmpi eq, %17, %70 : vector<2x256xi32>
      %72 = vector.shape_cast %69 : vector<2x1xf32> to vector<2x1xf32>
      %73 = vector.broadcast %72 : vector<2x1xf32> to vector<2x256xf32>
      %74 = arith.select %71, %73, %60 : vector<2x256xi1>, vector<2x256xf32>
      %c64_i32_41 = arith.constant 64 : i32
      %75 = vector.broadcast %c64_i32_41 : i32 to vector<2x256xi32>
      %76 = arith.cmpi sge, %17, %75 : vector<2x256xi32>
      %c80_i32 = arith.constant 80 : i32
      %77 = vector.broadcast %c80_i32 : i32 to vector<2x256xi32>
      %78 = arith.cmpi slt, %17, %77 : vector<2x256xi32>
      %79 = arith.andi %76, %78 : vector<2x256xi1>
      %cst_42 = arith.constant 0xFF800000 : f32
      %80 = vector.broadcast %cst_42 : f32 to vector<2x256xf32>
      %81 = arith.select %79, %16, %80 : vector<2x256xi1>, vector<2x256xf32>
      %cst_43 = arith.constant dense<0xFF800000> : vector<2xf32>
      %82 = vector.multi_reduction <maximumf>, %81, %cst_43 [1] : vector<2x256xf32> to vector<2xf32>
      %83 = vector.shape_cast %82 : vector<2xf32> to vector<2x1xf32>
      %c64_i32_44 = arith.constant 64 : i32
      %84 = vector.broadcast %c64_i32_44 : i32 to vector<2x256xi32>
      %85 = arith.cmpi eq, %17, %84 : vector<2x256xi32>
      %86 = vector.shape_cast %83 : vector<2x1xf32> to vector<2x1xf32>
      %87 = vector.broadcast %86 : vector<2x1xf32> to vector<2x256xf32>
      %88 = arith.select %85, %87, %74 : vector<2x256xi1>, vector<2x256xf32>
      %c80_i32_45 = arith.constant 80 : i32
      %89 = vector.broadcast %c80_i32_45 : i32 to vector<2x256xi32>
      %90 = arith.cmpi sge, %17, %89 : vector<2x256xi32>
      %c96_i32 = arith.constant 96 : i32
      %91 = vector.broadcast %c96_i32 : i32 to vector<2x256xi32>
      %92 = arith.cmpi slt, %17, %91 : vector<2x256xi32>
      %93 = arith.andi %90, %92 : vector<2x256xi1>
      %cst_46 = arith.constant 0xFF800000 : f32
      %94 = vector.broadcast %cst_46 : f32 to vector<2x256xf32>
      %95 = arith.select %93, %16, %94 : vector<2x256xi1>, vector<2x256xf32>
      %cst_47 = arith.constant dense<0xFF800000> : vector<2xf32>
      %96 = vector.multi_reduction <maximumf>, %95, %cst_47 [1] : vector<2x256xf32> to vector<2xf32>
      %97 = vector.shape_cast %96 : vector<2xf32> to vector<2x1xf32>
      %c80_i32_48 = arith.constant 80 : i32
      %98 = vector.broadcast %c80_i32_48 : i32 to vector<2x256xi32>
      %99 = arith.cmpi eq, %17, %98 : vector<2x256xi32>
      %100 = vector.shape_cast %97 : vector<2x1xf32> to vector<2x1xf32>
      %101 = vector.broadcast %100 : vector<2x1xf32> to vector<2x256xf32>
      %102 = arith.select %99, %101, %88 : vector<2x256xi1>, vector<2x256xf32>
      %c96_i32_49 = arith.constant 96 : i32
      %103 = vector.broadcast %c96_i32_49 : i32 to vector<2x256xi32>
      %104 = arith.cmpi sge, %17, %103 : vector<2x256xi32>
      %c112_i32 = arith.constant 112 : i32
      %105 = vector.broadcast %c112_i32 : i32 to vector<2x256xi32>
      %106 = arith.cmpi slt, %17, %105 : vector<2x256xi32>
      %107 = arith.andi %104, %106 : vector<2x256xi1>
      %cst_50 = arith.constant 0xFF800000 : f32
      %108 = vector.broadcast %cst_50 : f32 to vector<2x256xf32>
      %109 = arith.select %107, %16, %108 : vector<2x256xi1>, vector<2x256xf32>
      %cst_51 = arith.constant dense<0xFF800000> : vector<2xf32>
      %110 = vector.multi_reduction <maximumf>, %109, %cst_51 [1] : vector<2x256xf32> to vector<2xf32>
      %111 = vector.shape_cast %110 : vector<2xf32> to vector<2x1xf32>
      %c96_i32_52 = arith.constant 96 : i32
      %112 = vector.broadcast %c96_i32_52 : i32 to vector<2x256xi32>
      %113 = arith.cmpi eq, %17, %112 : vector<2x256xi32>
      %114 = vector.shape_cast %111 : vector<2x1xf32> to vector<2x1xf32>
      %115 = vector.broadcast %114 : vector<2x1xf32> to vector<2x256xf32>
      %116 = arith.select %113, %115, %102 : vector<2x256xi1>, vector<2x256xf32>
      %c112_i32_53 = arith.constant 112 : i32
      %117 = vector.broadcast %c112_i32_53 : i32 to vector<2x256xi32>
      %118 = arith.cmpi sge, %17, %117 : vector<2x256xi32>
      %c128_i32 = arith.constant 128 : i32
      %119 = vector.broadcast %c128_i32 : i32 to vector<2x256xi32>
      %120 = arith.cmpi slt, %17, %119 : vector<2x256xi32>
      %121 = arith.andi %118, %120 : vector<2x256xi1>
      %cst_54 = arith.constant 0xFF800000 : f32
      %122 = vector.broadcast %cst_54 : f32 to vector<2x256xf32>
      %123 = arith.select %121, %16, %122 : vector<2x256xi1>, vector<2x256xf32>
      %cst_55 = arith.constant dense<0xFF800000> : vector<2xf32>
      %124 = vector.multi_reduction <maximumf>, %123, %cst_55 [1] : vector<2x256xf32> to vector<2xf32>
      %125 = vector.shape_cast %124 : vector<2xf32> to vector<2x1xf32>
      %c112_i32_56 = arith.constant 112 : i32
      %126 = vector.broadcast %c112_i32_56 : i32 to vector<2x256xi32>
      %127 = arith.cmpi eq, %17, %126 : vector<2x256xi32>
      %128 = vector.shape_cast %125 : vector<2x1xf32> to vector<2x1xf32>
      %129 = vector.broadcast %128 : vector<2x1xf32> to vector<2x256xf32>
      %130 = arith.select %127, %129, %116 : vector<2x256xi1>, vector<2x256xf32>
      %c128_i32_57 = arith.constant 128 : i32
      %131 = vector.broadcast %c128_i32_57 : i32 to vector<2x256xi32>
      %132 = arith.cmpi sge, %17, %131 : vector<2x256xi32>
      %c144_i32 = arith.constant 144 : i32
      %133 = vector.broadcast %c144_i32 : i32 to vector<2x256xi32>
      %134 = arith.cmpi slt, %17, %133 : vector<2x256xi32>
      %135 = arith.andi %132, %134 : vector<2x256xi1>
      %cst_58 = arith.constant 0xFF800000 : f32
      %136 = vector.broadcast %cst_58 : f32 to vector<2x256xf32>
      %137 = arith.select %135, %16, %136 : vector<2x256xi1>, vector<2x256xf32>
      %cst_59 = arith.constant dense<0xFF800000> : vector<2xf32>
      %138 = vector.multi_reduction <maximumf>, %137, %cst_59 [1] : vector<2x256xf32> to vector<2xf32>
      %139 = vector.shape_cast %138 : vector<2xf32> to vector<2x1xf32>
      %c128_i32_60 = arith.constant 128 : i32
      %140 = vector.broadcast %c128_i32_60 : i32 to vector<2x256xi32>
      %141 = arith.cmpi eq, %17, %140 : vector<2x256xi32>
      %142 = vector.shape_cast %139 : vector<2x1xf32> to vector<2x1xf32>
      %143 = vector.broadcast %142 : vector<2x1xf32> to vector<2x256xf32>
      %144 = arith.select %141, %143, %130 : vector<2x256xi1>, vector<2x256xf32>
      %c144_i32_61 = arith.constant 144 : i32
      %145 = vector.broadcast %c144_i32_61 : i32 to vector<2x256xi32>
      %146 = arith.cmpi sge, %17, %145 : vector<2x256xi32>
      %c160_i32 = arith.constant 160 : i32
      %147 = vector.broadcast %c160_i32 : i32 to vector<2x256xi32>
      %148 = arith.cmpi slt, %17, %147 : vector<2x256xi32>
      %149 = arith.andi %146, %148 : vector<2x256xi1>
      %cst_62 = arith.constant 0xFF800000 : f32
      %150 = vector.broadcast %cst_62 : f32 to vector<2x256xf32>
      %151 = arith.select %149, %16, %150 : vector<2x256xi1>, vector<2x256xf32>
      %cst_63 = arith.constant dense<0xFF800000> : vector<2xf32>
      %152 = vector.multi_reduction <maximumf>, %151, %cst_63 [1] : vector<2x256xf32> to vector<2xf32>
      %153 = vector.shape_cast %152 : vector<2xf32> to vector<2x1xf32>
      %c144_i32_64 = arith.constant 144 : i32
      %154 = vector.broadcast %c144_i32_64 : i32 to vector<2x256xi32>
      %155 = arith.cmpi eq, %17, %154 : vector<2x256xi32>
      %156 = vector.shape_cast %153 : vector<2x1xf32> to vector<2x1xf32>
      %157 = vector.broadcast %156 : vector<2x1xf32> to vector<2x256xf32>
      %158 = arith.select %155, %157, %144 : vector<2x256xi1>, vector<2x256xf32>
      %c160_i32_65 = arith.constant 160 : i32
      %159 = vector.broadcast %c160_i32_65 : i32 to vector<2x256xi32>
      %160 = arith.cmpi sge, %17, %159 : vector<2x256xi32>
      %c176_i32 = arith.constant 176 : i32
      %161 = vector.broadcast %c176_i32 : i32 to vector<2x256xi32>
      %162 = arith.cmpi slt, %17, %161 : vector<2x256xi32>
      %163 = arith.andi %160, %162 : vector<2x256xi1>
      %cst_66 = arith.constant 0xFF800000 : f32
      %164 = vector.broadcast %cst_66 : f32 to vector<2x256xf32>
      %165 = arith.select %163, %16, %164 : vector<2x256xi1>, vector<2x256xf32>
      %cst_67 = arith.constant dense<0xFF800000> : vector<2xf32>
      %166 = vector.multi_reduction <maximumf>, %165, %cst_67 [1] : vector<2x256xf32> to vector<2xf32>
      %167 = vector.shape_cast %166 : vector<2xf32> to vector<2x1xf32>
      %c160_i32_68 = arith.constant 160 : i32
      %168 = vector.broadcast %c160_i32_68 : i32 to vector<2x256xi32>
      %169 = arith.cmpi eq, %17, %168 : vector<2x256xi32>
      %170 = vector.shape_cast %167 : vector<2x1xf32> to vector<2x1xf32>
      %171 = vector.broadcast %170 : vector<2x1xf32> to vector<2x256xf32>
      %172 = arith.select %169, %171, %158 : vector<2x256xi1>, vector<2x256xf32>
      %c176_i32_69 = arith.constant 176 : i32
      %173 = vector.broadcast %c176_i32_69 : i32 to vector<2x256xi32>
      %174 = arith.cmpi sge, %17, %173 : vector<2x256xi32>
      %c192_i32 = arith.constant 192 : i32
      %175 = vector.broadcast %c192_i32 : i32 to vector<2x256xi32>
      %176 = arith.cmpi slt, %17, %175 : vector<2x256xi32>
      %177 = arith.andi %174, %176 : vector<2x256xi1>
      %cst_70 = arith.constant 0xFF800000 : f32
      %178 = vector.broadcast %cst_70 : f32 to vector<2x256xf32>
      %179 = arith.select %177, %16, %178 : vector<2x256xi1>, vector<2x256xf32>
      %cst_71 = arith.constant dense<0xFF800000> : vector<2xf32>
      %180 = vector.multi_reduction <maximumf>, %179, %cst_71 [1] : vector<2x256xf32> to vector<2xf32>
      %181 = vector.shape_cast %180 : vector<2xf32> to vector<2x1xf32>
      %c176_i32_72 = arith.constant 176 : i32
      %182 = vector.broadcast %c176_i32_72 : i32 to vector<2x256xi32>
      %183 = arith.cmpi eq, %17, %182 : vector<2x256xi32>
      %184 = vector.shape_cast %181 : vector<2x1xf32> to vector<2x1xf32>
      %185 = vector.broadcast %184 : vector<2x1xf32> to vector<2x256xf32>
      %186 = arith.select %183, %185, %172 : vector<2x256xi1>, vector<2x256xf32>
      %c192_i32_73 = arith.constant 192 : i32
      %187 = vector.broadcast %c192_i32_73 : i32 to vector<2x256xi32>
      %188 = arith.cmpi sge, %17, %187 : vector<2x256xi32>
      %c208_i32 = arith.constant 208 : i32
      %189 = vector.broadcast %c208_i32 : i32 to vector<2x256xi32>
      %190 = arith.cmpi slt, %17, %189 : vector<2x256xi32>
      %191 = arith.andi %188, %190 : vector<2x256xi1>
      %cst_74 = arith.constant 0xFF800000 : f32
      %192 = vector.broadcast %cst_74 : f32 to vector<2x256xf32>
      %193 = arith.select %191, %16, %192 : vector<2x256xi1>, vector<2x256xf32>
      %cst_75 = arith.constant dense<0xFF800000> : vector<2xf32>
      %194 = vector.multi_reduction <maximumf>, %193, %cst_75 [1] : vector<2x256xf32> to vector<2xf32>
      %195 = vector.shape_cast %194 : vector<2xf32> to vector<2x1xf32>
      %c192_i32_76 = arith.constant 192 : i32
      %196 = vector.broadcast %c192_i32_76 : i32 to vector<2x256xi32>
      %197 = arith.cmpi eq, %17, %196 : vector<2x256xi32>
      %198 = vector.shape_cast %195 : vector<2x1xf32> to vector<2x1xf32>
      %199 = vector.broadcast %198 : vector<2x1xf32> to vector<2x256xf32>
      %200 = arith.select %197, %199, %186 : vector<2x256xi1>, vector<2x256xf32>
      %c208_i32_77 = arith.constant 208 : i32
      %201 = vector.broadcast %c208_i32_77 : i32 to vector<2x256xi32>
      %202 = arith.cmpi sge, %17, %201 : vector<2x256xi32>
      %c224_i32 = arith.constant 224 : i32
      %203 = vector.broadcast %c224_i32 : i32 to vector<2x256xi32>
      %204 = arith.cmpi slt, %17, %203 : vector<2x256xi32>
      %205 = arith.andi %202, %204 : vector<2x256xi1>
      %cst_78 = arith.constant 0xFF800000 : f32
      %206 = vector.broadcast %cst_78 : f32 to vector<2x256xf32>
      %207 = arith.select %205, %16, %206 : vector<2x256xi1>, vector<2x256xf32>
      %cst_79 = arith.constant dense<0xFF800000> : vector<2xf32>
      %208 = vector.multi_reduction <maximumf>, %207, %cst_79 [1] : vector<2x256xf32> to vector<2xf32>
      %209 = vector.shape_cast %208 : vector<2xf32> to vector<2x1xf32>
      %c208_i32_80 = arith.constant 208 : i32
      %210 = vector.broadcast %c208_i32_80 : i32 to vector<2x256xi32>
      %211 = arith.cmpi eq, %17, %210 : vector<2x256xi32>
      %212 = vector.shape_cast %209 : vector<2x1xf32> to vector<2x1xf32>
      %213 = vector.broadcast %212 : vector<2x1xf32> to vector<2x256xf32>
      %214 = arith.select %211, %213, %200 : vector<2x256xi1>, vector<2x256xf32>
      %c224_i32_81 = arith.constant 224 : i32
      %215 = vector.broadcast %c224_i32_81 : i32 to vector<2x256xi32>
      %216 = arith.cmpi sge, %17, %215 : vector<2x256xi32>
      %c240_i32 = arith.constant 240 : i32
      %217 = vector.broadcast %c240_i32 : i32 to vector<2x256xi32>
      %218 = arith.cmpi slt, %17, %217 : vector<2x256xi32>
      %219 = arith.andi %216, %218 : vector<2x256xi1>
      %cst_82 = arith.constant 0xFF800000 : f32
      %220 = vector.broadcast %cst_82 : f32 to vector<2x256xf32>
      %221 = arith.select %219, %16, %220 : vector<2x256xi1>, vector<2x256xf32>
      %cst_83 = arith.constant dense<0xFF800000> : vector<2xf32>
      %222 = vector.multi_reduction <maximumf>, %221, %cst_83 [1] : vector<2x256xf32> to vector<2xf32>
      %223 = vector.shape_cast %222 : vector<2xf32> to vector<2x1xf32>
      %c224_i32_84 = arith.constant 224 : i32
      %224 = vector.broadcast %c224_i32_84 : i32 to vector<2x256xi32>
      %225 = arith.cmpi eq, %17, %224 : vector<2x256xi32>
      %226 = vector.shape_cast %223 : vector<2x1xf32> to vector<2x1xf32>
      %227 = vector.broadcast %226 : vector<2x1xf32> to vector<2x256xf32>
      %228 = arith.select %225, %227, %214 : vector<2x256xi1>, vector<2x256xf32>
      %c240_i32_85 = arith.constant 240 : i32
      %229 = vector.broadcast %c240_i32_85 : i32 to vector<2x256xi32>
      %230 = arith.cmpi sge, %17, %229 : vector<2x256xi32>
      %c256_i32 = arith.constant 256 : i32
      %231 = vector.broadcast %c256_i32 : i32 to vector<2x256xi32>
      %232 = arith.cmpi slt, %17, %231 : vector<2x256xi32>
      %233 = arith.andi %230, %232 : vector<2x256xi1>
      %cst_86 = arith.constant 0xFF800000 : f32
      %234 = vector.broadcast %cst_86 : f32 to vector<2x256xf32>
      %235 = arith.select %233, %16, %234 : vector<2x256xi1>, vector<2x256xf32>
      %cst_87 = arith.constant dense<0xFF800000> : vector<2xf32>
      %236 = vector.multi_reduction <maximumf>, %235, %cst_87 [1] : vector<2x256xf32> to vector<2xf32>
      %237 = vector.shape_cast %236 : vector<2xf32> to vector<2x1xf32>
      %c240_i32_88 = arith.constant 240 : i32
      %238 = vector.broadcast %c240_i32_88 : i32 to vector<2x256xi32>
      %239 = arith.cmpi eq, %17, %238 : vector<2x256xi32>
      %240 = vector.shape_cast %237 : vector<2x1xf32> to vector<2x1xf32>
      %241 = vector.broadcast %240 : vector<2x1xf32> to vector<2x256xf32>
      %242 = arith.select %239, %241, %228 : vector<2x256xi1>, vector<2x256xf32>
      %c0_89 = arith.constant 0 : index
      %c0_90 = arith.constant 0 : index
      %243 = vector.load %arg3[%c0_89, %c0_90] : memref<256x1xf32, #tpu.memory_space<vmem>>, vector<256x1xf32>
      %cst_91 = arith.constant dense<0.000000e+00> : vector<2x1xf32>
      %244 = tpu.matmul %14, %243, %cst_91 {dimension_numbers = #tpu.dot_dimension_numbers<[1], [0], [0], [1], [0, 0, 1, 1], [], []>} : vector<2x256xf32>, vector<256x1xf32>, vector<2x1xf32> -> vector<2x1xf32>
      %cst_92 = arith.constant 0.000000e+00 : f32
      %245 = vector.broadcast %cst_92 : f32 to vector<2x1xf32>
      %246 = arith.maximumf %244, %245 : vector<2x1xf32>
      %c0_93 = arith.constant 0 : index
      %c0_94 = arith.constant 0 : index
      %247 = vector.load %arg4[%c0_93, %c0_94] : memref<256x1xf32, #tpu.memory_space<vmem>>, vector<256x1xf32>
      %cst_95 = arith.constant dense<0.000000e+00> : vector<2x1xf32>
      %248 = tpu.matmul %242, %247, %cst_95 {dimension_numbers = #tpu.dot_dimension_numbers<[1], [0], [0], [1], [0, 0, 1, 1], [], []>} : vector<2x256xf32>, vector<256x1xf32>, vector<2x1xf32> -> vector<2x1xf32>
      %cst_96 = arith.constant 0.000000e+00 : f32
      %249 = vector.broadcast %cst_96 : f32 to vector<2x1xf32>
      %250 = arith.maximumf %248, %249 : vector<2x1xf32>
      %251 = arith.addf %246, %250 : vector<2x1xf32>
      %c0_97 = arith.constant 0 : index
      %c0_98 = arith.constant 0 : index
      %252 = vector.load %arg5[%c0_97, %c0_98] : memref<1x16xf32, #tpu.memory_space<vmem>>, vector<1x16xf32>
      %cst_99 = arith.constant dense<0.000000e+00> : vector<2x16xf32>
      %253 = tpu.matmul %251, %252, %cst_99 {dimension_numbers = #tpu.dot_dimension_numbers<[1], [0], [0], [1], [0, 0, 1, 1], [], []>} : vector<2x1xf32>, vector<1x16xf32>, vector<2x16xf32> -> vector<2x16xf32>
      %254 = arith.negf %253 : vector<2x16xf32>
      %255 = math.exp %254 : vector<2x16xf32>
      %cst_100 = arith.constant 1.000000e+00 : f32
      %256 = vector.broadcast %cst_100 : f32 to vector<2x16xf32>
      %257 = arith.addf %256, %255 : vector<2x16xf32>
      %258 = arith.divf %256, %257 : vector<2x16xf32>
      %c0_101 = arith.constant 0 : index
      %c0_102 = arith.constant 0 : index
      %259 = vector.load %arg6[%c0_101, %c0_102] : memref<2x16xf32, #tpu.memory_space<vmem>>, vector<2x16xf32>
      tpu.vector_store %arg6[%c0_101, %c0_102], %258 {strides = array<i32>} : memref<2x16xf32, #tpu.memory_space<vmem>>, vector<2x16xf32>,
    } else {
    }
    return
  }
  func.func @transform_0(%arg0: i32, %arg1: i32) -> (i32, i32, i32) {
    %c0_i32 = arith.constant 0 : i32
    %c0_i32_0 = arith.constant 0 : i32
    return %arg0, %arg1, %c0_i32 : i32, i32, i32
  }
  func.func @transform_1(%arg0: i32, %arg1: i32) -> (i32, i32) {
    %c0_i32 = arith.constant 0 : i32
    %c0_i32_0 = arith.constant 0 : i32
    %c0_i32_1 = arith.constant 0 : i32
    return %c0_i32, %c0_i32_0 : i32, i32
  }
  func.func @transform_2(%arg0: i32, %arg1: i32) -> (i32, i32) {
    %c0_i32 = arith.constant 0 : i32
    %c0_i32_0 = arith.constant 0 : i32
    %c0_i32_1 = arith.constant 0 : i32
    return %c0_i32, %c0_i32_0 : i32, i32
  }
  func.func @transform_3(%arg0: i32, %arg1: i32) -> (i32, i32) {
    %c0_i32 = arith.constant 0 : i32
    %c0_i32_0 = arith.constant 0 : i32
    %c0_i32_1 = arith.constant 0 : i32
    return %c0_i32, %c0_i32_0 : i32, i32
  }
  func.func @transform_4(%arg0: i32, %arg1: i32) -> (i32, i32) {
    %c0_i32 = arith.constant 0 : i32
    %c0_i32_0 = arith.constant 0 : i32
    return %arg0, %c0_i32 : i32, i32
  }
}

</mosaic_0001>

<bundles_post_ra>
// kernel: tpu_custom_call.1
= control target key start
LH: loop header
LB: loop body
LE: loop exit
PB: predicated region body
PF: predicated region fallthrough
CT: control target
= control target key end

     0   :  { %6 = vsyncpa [#allocation3], 0  ;;  %s128_s0 = inlined_call_operand.hbm [shape: f32[8,128], index: 0, kind: input, shape index: {}]   ;;  %s129_s1 = inlined_call_operand.hbm [shape: f32[8,128], index: 1, kind: output, shape index: {}]  }
   0x1   :  { %7 = vsyncpa [#allocation4], 0  ;;  %s91_s6 = smov [#allocation2]   ;;  %s43_s10 = scalar_lea.hbm %s128_s0, 128 }
   0x2   :  { %s14_s7 = sshll.u32 %s91_s6, 4  ;;  %p44_p0 = scmp.ne.s32.totalorder %s128_s0, %s43_s10  ;;  %s15_s7 = int_to_ptr.vmem [resolvable:$true] %s14_s7 }
   0x3   :  { %p47_p1 = scmp.lt.u32.totalorder %s43_s10, %s128_s0 }
   0x5   :  { %p49_p2 = pnand %p47_p1, %p44_p0 }
   0x7   :  { %52 = shalt.err (!%p49_p2)
}
   0x8   :  { %s53_s15 = scalar_lea.vmem %s15_s7, 128  ;;  %p58_p4 = scmp.lt.s32.totalorder %s15_s7, %s15_s7 }
   0x9   :  { %p54_p3 = scmp.ne.s32.totalorder %s15_s7, %s53_s15  ;;  %p59_p5 = scmp.lt.s32.totalorder %s53_s15, %s53_s15 }
   0xb   :  { %p60_p6 = por %p59_p5, %p58_p4 }
   0xd   :  { %p61_p7 = pnand %p60_p6, %p54_p3 }
   0xf   :  { %64 = shalt.err (!%p61_p7)
}
  0x10   :  { %17 = dma.hbm_to_vmem [thread:$0]  %s128_s0, 128, %s15_s7, [#allocation3]  }
  0x11   :  { %87 = dma.done.wait [#allocation3], 128  }
  0x12   :  { %88 = vsyncadd [#allocation3], 4294967168  ;;  %v21_v0 = vld [vmem:[#allocation2] sm:$0xff]  ;;  %s92_s18 = smov 1   ;;  %s93_s19 = smov [#allocation5]  }
  0x13   :  { %22 = vrot.lane.b32.xlu0 %v21_v0, %s92_s18  ;;  %s31_s20 = sshll.u32 %s93_s19, 4  ;;  %s32_s20 = int_to_ptr.vmem [resolvable:$true] %s31_s20 }
  0x14   :  { %s65_s21 = scalar_lea.vmem %s32_s20, 128  ;;  %p70_p9 = scmp.lt.s32.totalorder %s32_s20, %s32_s20 }
  0x15   :  { %p66_p8 = scmp.ne.s32.totalorder %s32_s20, %s65_s21  ;;  %p71_p10 = scmp.lt.s32.totalorder %s65_s21, %s65_s21 }
  0x17   :  { %p72_p11 = por %p71_p10, %p70_p9 }
  0x19   :  { %p73_p12 = pnand %p72_p11, %p66_p8 }
  0x85   :  { %v23_v1 = vpop.permute.xlu0 %22 }
  0x86   :  { %24 = vst [vmem:[#allocation5] sm:$0xff] %v23_v1 }
  0x87   :  { %76 = shalt.err (!%p73_p12)
}
  0x88   :  { %s77_s0 = scalar_lea.hbm %s129_s1, 128 }
  0x89   :  { %p78_p13 = scmp.ne.s32.totalorder %s129_s1, %s77_s0  ;;  %p81_p0 = scmp.lt.u32.totalorder %s77_s0, %s129_s1 }
  0x8b   :  { %p83_p1 = pnand %p81_p0, %p78_p13 }
  0x8d   :  { %86 = shalt.err (!%p83_p1)
}
  0x8e   :  { %34 = dma.vmem_to_hbm [thread:$0]  %s32_s20, 128, %s129_s1, [#allocation4]  }
  0x8f   :  { %89 = dma.done.wait [#allocation4], 128  }
  0x90   :  { %90 = vsyncadd [#allocation4], 4294967168 }
  0x91   :  { %38 = vsyncpa [#allocation3], 1 }
  0x92   :  { %39 = vsyncpa [#allocation4], 1 }

// kernel: tpu_custom_call.1
= control target key start
LH: loop header
LB: loop body
LE: loop exit
PB: predicated region body
PF: predicated region fallthrough
CT: control target
= control target key end

     0   :  { %vm51_vm0 = vcmask 1043456   ;;  %v116_v2 = vlaneseq  ;;  %s1340_s0 = inlined_call_operand.vmem [shape: f32[2,4,256], index: 0, kind: input, shape index: {}]   ;;  %s1341_s1 = inlined_call_operand.vmem [shape: f32[256,1], index: 1, kind: input, shape index: {}]   ;;  %s1342_s2 = inlined_call_operand.vmem [shape: f32[256,1], index: 2, kind: input, shape index: {}]   ;;  %s1343_s3 = inlined_call_operand.vmem [shape: f32[1,16], index: 3, kind: input, shape index: {}]   ;;  %s1344_s4 = inlined_call_operand.hbm [shape: f32[2,16], index: 4, kind: output, shape index: {}]  }
   0x1   :  { %v925_v0 = vld [vmem:[%s1340_s0] sm:$0xff]  ;;  %v930_v1 = vld [vmem:[%s1340_s0 + $0x8] sm:$0xff] }
   0x2   :  { %v417_v3 = vld [vmem:[%s1341_s1 + $0x80] sm:$0xff]  ;;  %v88_v4 = vsel %vm51_vm0, %v925_v0, -inf  ;;  %v102_v5 = vsel %vm51_vm0, %v930_v1, -inf  ;;  %v941_v6 = vcombine.high %v925_v0, %v925_v0  ;;  %v945_v7 = vcombine.high %v930_v1, %v930_v1  ;;  %v418_v8 = vld [vmem:[%s1341_s1 + $0x88] sm:$0xff] }
   0x3   :  { %v401_v9 = vld [vmem:[%s1341_s1] sm:$0xff]  ;;  %v402_v10 = vld [vmem:[%s1341_s1 + $0x8] sm:$0xff]  ;;  %v89_v11 = vrot.slane %v88_v4, 4  ;;  %v103_v12 = vrot.slane %v102_v5, 4  ;;  %v956_v13 = vand.u32 127, %v116_v2  ;;  %v797_v14 = vpack.c.bf16 %v418_v8, %v417_v3 }
   0x4   :  { %v528_v15 = vld [vmem:[%s1342_s2 + $0x80] sm:$0xff]  ;;  %v529_v16 = vld [vmem:[%s1342_s2 + $0x88] sm:$0xff]  ;;  %v95_v17 = vsel %vm51_vm0, %v941_v6, -inf  ;;  %v109_v18 = vsel %vm51_vm0, %v945_v7, -inf  ;;  %v799_v19 = vpack.c.bf16 %v402_v10, %v401_v9 }
   0x5   :  { %v829_v20 = vpack.c.bf16 %v529_v16, %v528_v15 }
   0x6   :  { %9 = vsyncpa [#allocation5], 0  ;;  %v90_v21 = vmax.f32 %v88_v4, %v89_v11  ;;  %v104_v22 = vmax.f32 %v102_v5, %v103_v12  ;;  %798 = vmatprep.subr.bf16.mxu0 %v797_v14  ;;  %v96_v23 = vrot.slane %v95_v17, 4  ;;  %v110_v26 = vrot.slane %v109_v18, 4  ;;  %v512_v62 = vld [vmem:[%s1342_s2] sm:$0xff]  ;;  %v513_v63 = vld [vmem:[%s1342_s2 + $0x8] sm:$0xff] }
   0x7   :  { %800 = vmatpush3.bf16.msra.mxu0 %v799_v19  ;;  %830 = vmatprep.subr.bf16.mxu1 %v829_v20  ;;  %vm146_vm1 = vcmp.ge.s32.totalorder %v956_v13, 16  ;;  %vm148_vm2 = vcmp.lt.s32.totalorder %v956_v13, 32  ;;  %vm163_vm3 = vcmp.ge.s32.totalorder %v956_v13, 32  ;;  %vm165_vm4 = vcmp.lt.s32.totalorder %v956_v13, 48  ;;  %v419_v19 = vld [vmem:[%s1341_s1 + $0x90] sm:$0xff]  ;;  %v420_v20 = vld [vmem:[%s1341_s1 + $0x98] sm:$0xff] }
   0x8   :  { %v91_v24 = vrot.slane %v90_v21, 2  ;;  %v105_v25 = vrot.slane %v104_v22, 2  ;;  %v97_v27 = vmax.f32 %v95_v17, %v96_v23  ;;  %v111_v30 = vmax.f32 %v109_v18, %v110_v26  ;;  %vm975_vm6 = vmand %vm146_vm1, %vm148_vm2  ;;  %v530_v26 = vld [vmem:[%s1342_s2 + $0x90] sm:$0xff]  ;;  %v533_v49 = vld [vmem:[%s1342_s2 + $0xa8] sm:$0xff] }
   0x9   :  { %v973_v35 = vadd.s32 128, %v956_v13  ;;  %vm129_vm5 = vcmask 1041409   ;;  %vm121_vm7 = vcmp.lt.s32.totalorder %v956_v13, 16  ;;  %vm180_vm8 = vcmp.ge.s32.totalorder %v956_v13, 48  ;;  %vm981_vm9 = vmand %vm163_vm3, %vm165_vm4  ;;  %v408_v61 = vld [vmem:[%s1341_s1 + $0x38] sm:$0xff]  ;;  %v426_v10 = vld [vmem:[%s1341_s1 + $0xc8] sm:$0xff] }
   0xa   :  { %v92_v28 = vmax.f32 %v90_v21, %v91_v24  ;;  %v106_v29 = vmax.f32 %v104_v22, %v105_v25  ;;  %v98_v31 = vrot.slane %v97_v27, 2  ;;  %v112_v34 = vrot.slane %v111_v30, 2  ;;  %v403_v24 = vld [vmem:[%s1341_s1 + $0x10] sm:$0xff]  ;;  %v404_v25 = vld [vmem:[%s1341_s1 + $0x18] sm:$0xff]  ;;  %v410_v16 = vld [vmem:[%s1341_s1 + $0x48] sm:$0xff] }
   0xb   :  { %vm182_vm10 = vcmp.lt.s32.totalorder %v956_v13, 64  ;;  %vm136_vm11 = vcmask 1041408   ;;  %vm300_vm12 = vcmp.ge.s32.totalorder %v973_v35, 160  ;;  %vm302_vm13 = vcmp.lt.s32.totalorder %v973_v35, 176  ;;  %v519_v8 = vld [vmem:[%s1342_s2 + $0x38] sm:$0xff]  ;;  %v536_v17 = vld [vmem:[%s1342_s2 + $0xc0] sm:$0xff] }
   0xc   :  { %v93_v32 = vrot.slane %v92_v28, 1  ;;  %v107_v33 = vrot.slane %v106_v29, 1  ;;  %v99_v37 = vmax.f32 %v97_v27, %v98_v31  ;;  %v113_v41 = vmax.f32 %v111_v30, %v112_v34  ;;  %vm1004_vm1 = vmand %vm180_vm8, %vm182_vm10  ;;  %v531_v30 = vld [vmem:[%s1342_s2 + $0x98] sm:$0xff]  ;;  %v514_v31 = vld [vmem:[%s1342_s2 + $0x10] sm:$0xff] }
   0xd   :  { %vm268_vm14 = vcmp.lt.s32.totalorder %v973_v35, 144  ;;  %vm197_vm15 = vcmp.ge.s32.totalorder %v956_v13, 64  ;;  %vm1010_vm2 = vmand %vm300_vm12, %vm302_vm13  ;;  %vm199_vm3 = vcmp.lt.s32.totalorder %v956_v13, 80  ;;  %vm317_vm4 = vcmp.ge.s32.totalorder %v973_v35, 176 }
   0xe   :  { %v94_v38 = vmax.f32 %v92_v28, %v93_v32  ;;  %v108_v39 = vmax.f32 %v106_v29, %v107_v33  ;;  %v100_v42 = vrot.slane %v99_v37, 1  ;;  %v114_v44 = vrot.slane %v113_v41, 1  ;;  %v515_v32 = vld [vmem:[%s1342_s2 + $0x18] sm:$0xff] }
   0xf   :  { %vm285_vm10 = vcmp.lt.s32.totalorder %v973_v35, 160  ;;  %vm334_vm12 = vcmp.ge.s32.totalorder %v973_v35, 192  ;;  %vm336_vm13 = vcmp.lt.s32.totalorder %v973_v35, 208  ;;  %v831_v9 = vpack.c.bf16 %v513_v63, %v512_v62  ;;  %v534_v62 = vld [vmem:[%s1342_s2 + $0xb0] sm:$0xff] }
  0x10   :  { %v989_v43 = vsel %vm129_vm5, %v108_v39, %v94_v38  ;;  %v101_v48 = vmax.f32 %v99_v37, %v100_v42  ;;  %v115_v52 = vmax.f32 %v113_v41, %v114_v44  ;;  %v801_v23 = vpack.c.bf16 %v420_v20, %v419_v19  ;;  %v421_v37 = vld [vmem:[%s1341_s1 + $0xa0] sm:$0xff]  ;;  %v422_v38 = vld [vmem:[%s1341_s1 + $0xa8] sm:$0xff] }
  0x11   :  { %v152_v45 = vsel %vm975_vm6, %v989_v43, -inf  ;;  %v134_v46 = vsel %vm121_vm7, %v989_v43, -inf  ;;  %v169_v47 = vsel %vm981_vm9, %v989_v43, -inf  ;;  %vm319_vm6 = vcmp.lt.s32.totalorder %v973_v35, 192  ;;  %vm1032_vm7 = vmand %vm197_vm15, %vm199_vm3  ;;  %832 = vmatpush3.bf16.msra.mxu1 %v831_v9  ;;  %v405_v42 = vld [vmem:[%s1341_s1 + $0x20] sm:$0xff]  ;;  %v406_v44 = vld [vmem:[%s1341_s1 + $0x28] sm:$0xff] }
  0x12   :  { %v154_v50 = vsel %vm136_vm11, %v152_v45, -inf  ;;  %v137_v51 = vsel %vm136_vm11, %v134_v46, -inf  ;;  %v171_v54 = vsel %vm136_vm11, %v169_v47, -inf  ;;  %v1019_v55 = vsel %vm129_vm5, %v115_v52, %v101_v48  ;;  %vm1037_vm8 = vmand %vm317_vm4, %vm319_vm6  ;;  %802 = vmatprep.subr.bf16.mxu0 %v801_v23  ;;  %v532_v45 = vld [vmem:[%s1342_s2 + $0xa0] sm:$0xff]  ;;  %v537_v19 = vld [vmem:[%s1342_s2 + $0xc8] sm:$0xff] }
  0x13   :  { %157 = vmax.xlane.f32.xlu1 %v154_v50  ;;  %140 = vmax.xlane.f32.xlu0 %v137_v51  ;;  %v272_v56 = vsel %vm268_vm14, %v1019_v55, -inf  ;;  %v186_v57 = vsel %vm1004_vm1, %v989_v43, -inf  ;;  %v306_v58 = vsel %vm1010_vm2, %v1019_v55, -inf  ;;  %vm283_vm9 = vcmp.ge.s32.totalorder %v973_v35, 144  ;;  %vm1063_vm15 = vmand %vm334_vm12, %vm336_vm13  ;;  %v516_v50 = vld [vmem:[%s1342_s2 + $0x20] sm:$0xff]  ;;  %v517_v51 = vld [vmem:[%s1342_s2 + $0x28] sm:$0xff] }
  0x14   :  { %v274_v60 = vsel %vm136_vm11, %v272_v56, -inf  ;;  %v188_v2 = vsel %vm136_vm11, %v186_v57, -inf  ;;  %v308_v3 = vsel %vm136_vm11, %v306_v58, -inf  ;;  %v203_v4 = vsel %vm1032_vm7, %v989_v43, -inf  ;;  %vm1059_vm14 = vmand %vm283_vm9, %vm285_vm10  ;;  %v424_v56 = vld [vmem:[%s1341_s1 + $0xb8] sm:$0xff]  ;;  %v520_v20 = vld [vmem:[%s1342_s2 + $0x40] sm:$0xff] }
  0x15   :  { %v323_v5 = vsel %vm1037_vm8, %v1019_v55, -inf  ;;  %vm214_vm1 = vcmp.ge.s32.totalorder %v956_v13, 80  ;;  %vm216_vm2 = vcmp.lt.s32.totalorder %v956_v13, 96  ;;  %vm351_vm3 = vcmp.ge.s32.totalorder %v973_v35, 208 }
  0x16   :  { %vm353_vm4 = vcmp.lt.s32.totalorder %v973_v35, 224  ;;  %v205_v11 = vsel %vm136_vm11, %v203_v4, -inf  ;;  %v325_v12 = vsel %vm136_vm11, %v323_v5, -inf  ;;  %vm231_vm6 = vcmp.ge.s32.totalorder %v956_v13, 96  ;;  %vm1081_vm8 = vmand %vm214_vm1, %vm216_vm2  ;;  %v535_v4 = vld [vmem:[%s1342_s2 + $0xb8] sm:$0xff]  ;;  %v518_v5 = vld [vmem:[%s1342_s2 + $0x30] sm:$0xff] }
  0x17   :  { %174 = vmax.xlane.f32.xlu1 %v171_v54  ;;  %276 = vmax.xlane.f32.xlu0 %v274_v60  ;;  %vm233_vm7 = vcmp.lt.s32.totalorder %v956_v13, 112  ;;  %v289_v14 = vsel %vm1059_vm14, %v1019_v55, -inf  ;;  %v340_v15 = vsel %vm1063_vm15, %v1019_v55, -inf  ;;  %vm1085_vm9 = vmand %vm351_vm3, %vm353_vm4  ;;  %vm368_vm12 = vcmp.ge.s32.totalorder %v973_v35, 224  ;;  %v423_v54 = vld [vmem:[%s1341_s1 + $0xb0] sm:$0xff] }
  0x18   :  { %vm1089_vm10 = vmand %vm231_vm6, %vm233_vm7  ;;  %vm370_vm13 = vcmp.lt.s32.totalorder %v973_v35, 240  ;;  %v291_v21 = vsel %vm136_vm11, %v289_v14, -inf  ;;  %v342_v22 = vsel %vm136_vm11, %v340_v15, -inf  ;;  %v220_v27 = vsel %vm1081_vm8, %v989_v43, -inf  ;;  %v407_v60 = vld [vmem:[%s1341_s1 + $0x30] sm:$0xff]  ;;  %v409_v15 = vld [vmem:[%s1341_s1 + $0x40] sm:$0xff] }
  0x19   :  { %v357_v28 = vsel %vm1085_vm9, %v1019_v55, -inf  ;;  %v803_v29 = vpack.c.bf16 %v404_v25, %v403_v24  ;;  %vm1131_vm14 = vmand %vm368_vm12, %vm370_vm13  ;;  %v833_v34 = vpack.c.bf16 %v531_v30, %v530_v26  ;;  %v835_v36 = vpack.c.bf16 %v515_v32, %v514_v31  ;;  %v427_v24 = vld [vmem:[%s1341_s1 + $0xd0] sm:$0xff]  ;;  %v428_v25 = vld [vmem:[%s1341_s1 + $0xd8] sm:$0xff] }
  0x1a   :  { %v222_v39 = vsel %vm136_vm11, %v220_v27, -inf  ;;  %v359_v40 = vsel %vm136_vm11, %v357_v28, -inf  ;;  %v805_v41 = vpack.c.bf16 %v422_v38, %v421_v37  ;;  %v237_v46 = vsel %vm1089_vm10, %v989_v43, -inf  ;;  %v412_v30 = vld [vmem:[%s1341_s1 + $0x58] sm:$0xff]  ;;  %v538_v31 = vld [vmem:[%s1342_s2 + $0xd0] sm:$0xff] }
  0x1b   :  { %191 = vmax.xlane.f32.xlu1 %v188_v2  ;;  %310 = vmax.xlane.f32.xlu0 %v308_v3  ;;  %v374_v47 = vsel %vm1131_vm14, %v1019_v55, -inf  ;;  %v807_v48 = vpack.c.bf16 %v406_v44, %v405_v42  ;;  %vm248_vm15 = vcmp.ge.s32.totalorder %v956_v13, 112  ;;  %vm385_vm1 = vcmp.ge.s32.totalorder %v973_v35, 240  ;;  %v523_v37 = vld [vmem:[%s1342_s2 + $0x58] sm:$0xff]  ;;  %v429_v42 = vld [vmem:[%s1341_s1 + $0xe0] sm:$0xff]  ;;  %v430_v44 = vld [vmem:[%s1341_s1 + $0xe8] sm:$0xff] }
  0x1c   :  { %804 = vmatpush3.bf16.msra.mxu0 %v803_v29  ;;  %834 = vmatprep.subr.bf16.mxu1 %v833_v34  ;;  %v837_v52 = vpack.c.bf16 %v533_v49, %v532_v45  ;;  %v839_v53 = vpack.c.bf16 %v517_v51, %v516_v50  ;;  %v239_v57 = vsel %vm136_vm11, %v237_v46, -inf  ;;  %v376_v58 = vsel %vm136_vm11, %v374_v47, -inf  ;;  %v411_v29 = vld [vmem:[%s1341_s1 + $0x50] sm:$0xff]  ;;  %v539_v34 = vld [vmem:[%s1342_s2 + $0xd8] sm:$0xff]  ;;  %v414_v49 = vld [vmem:[%s1341_s1 + $0x68] sm:$0xff] }
  0x1d   :  { %836 = vmatpush3.bf16.msra.mxu1 %v835_v36  ;;  %806 = vmatprep.subr.bf16.mxu0 %v805_v41  ;;  %v809_v59 = vpack.c.bf16 %v424_v56, %v423_v54  ;;  %v254_v63 = vsel %vm248_vm15, %v989_v43, -inf  ;;  %v391_v2 = vsel %vm385_vm1, %v1019_v55, -inf  ;;  %v811_v3 = vpack.c.bf16 %v408_v61, %v407_v60  ;;  %v425_v55 = vld [vmem:[%s1341_s1 + $0xc0] sm:$0xff]  ;;  %v522_v36 = vld [vmem:[%s1342_s2 + $0x50] sm:$0xff]  ;;  %v525_v56 = vld [vmem:[%s1342_s2 + $0x68] sm:$0xff] }
  0x1e   :  { %838 = vmatprep.subr.bf16.mxu1 %v837_v52  ;;  %v841_v43 = vpack.c.bf16 %v535_v4, %v534_v62  ;;  %v843_v9 = vpack.c.bf16 %v519_v8, %v518_v5  ;;  %v813_v14 = vpack.c.bf16 %v426_v10, %v425_v55  ;;  %v815_v18 = vpack.c.bf16 %v410_v16, %v409_v15  ;;  %v540_v50 = vld [vmem:[%s1342_s2 + $0xe0] sm:$0xff]  ;;  %v415_v8 = vld [vmem:[%s1341_s1 + $0x70] sm:$0xff]  ;;  %v527_v15 = vld [vmem:[%s1342_s2 + $0x78] sm:$0xff] }
  0x1f   :  { %208 = vmax.xlane.f32.xlu1 %v205_v11  ;;  %327 = vmax.xlane.f32.xlu0 %v325_v12  ;;  %v256_v11 = vsel %vm136_vm11, %v254_v63, -inf  ;;  %v393_v12 = vsel %vm136_vm11, %v391_v2, -inf  ;;  %v59_v26 = vsel %vm51_vm0, %v941_v6, 0.0  ;;  %v73_v27 = vsel %vm51_vm0, %v945_v7, 0.0  ;;  %v524_v54 = vld [vmem:[%s1342_s2 + $0x60] sm:$0xff]  ;;  %v431_v63 = vld [vmem:[%s1341_s1 + $0xf0] sm:$0xff] }
  0x20   :  { %808 = vmatpush3.bf16.msra.mxu0 %v807_v48  ;;  %v817_v28 = vpack.c.bf16 %v428_v25, %v427_v24  ;;  %v60_v32 = vrot.slane %v59_v26, 4  ;;  %v74_v6 = vrot.slane %v73_v27, 4  ;;  %v52_v7 = vsel %vm51_vm0, %v925_v0, 0.0  ;;  %v432_v2 = vld [vmem:[%s1341_s1 + $0xf8] sm:$0xff] }
  0x21   :  { %840 = vmatpush3.bf16.msra.mxu1 %v839_v53  ;;  %810 = vmatprep.subr.bf16.mxu0 %v809_v59  ;;  %v819_v33 = vpack.c.bf16 %v412_v30, %v411_v29  ;;  %v53_v38 = vrot.slane %v52_v7, 4  ;;  %v849_v0 = vpack.c.bf16 %v539_v34, %v538_v31  ;;  %v821_v48 = vpack.c.bf16 %v430_v44, %v429_v42  ;;  %v541_v53 = vld [vmem:[%s1342_s2 + $0xe8] sm:$0xff] }
  0x22   :  { %842 = vmatprep.subr.bf16.mxu1 %v841_v43  ;;  %v61_v41 = vadd.f32 %v60_v32, %v59_v26  ;;  %v75_v45 = vadd.f32 %v74_v6, %v73_v27  ;;  %v853_v59 = vpack.c.bf16 %v541_v53, %v540_v50  ;;  %v855_v60 = vpack.c.bf16 %v525_v56, %v524_v54  ;;  %v416_v43 = vld [vmem:[%s1341_s1 + $0x78] sm:$0xff] }
  0x23   :  { %293 = vmax.xlane.f32.xlu1 %v291_v21  ;;  %344 = vmax.xlane.f32.xlu0 %v342_v22  ;;  %v521_v21 = vld [vmem:[%s1342_s2 + $0x48] sm:$0xff]  ;;  %v845_v22 = vpack.c.bf16 %v537_v19, %v536_v17  ;;  %v54_v46 = vadd.f32 %v53_v38, %v52_v7  ;;  %v825_v5 = vpack.c.bf16 %v432_v2, %v431_v63  ;;  %vm296_vm11 = vcmp.eq.s32.totalorder %v973_v35, 144 }
  0x24   :  { %812 = vmatpush3.bf16.msra.mxu0 %v811_v3  ;;  %v847_v23 = vpack.c.bf16 %v521_v21, %v520_v20  ;;  %v62_v51 = vrot.slane %v61_v41, 2  ;;  %vm313_vm2 = vcmp.eq.s32.totalorder %v973_v35, 160  ;;  %vm330_vm3 = vcmp.eq.s32.totalorder %v973_v35, 176 }
  0x25   :  { %844 = vmatpush3.bf16.msra.mxu1 %v843_v9  ;;  %814 = vmatprep.subr.bf16.mxu0 %v813_v14  ;;  %v542_v9 = vld [vmem:[%s1342_s2 + $0xf0] sm:$0xff]  ;;  %vm159_vm4 = vcmp.eq.s32.totalorder %v956_v13, 16  ;;  %vm176_vm6 = vcmp.eq.s32.totalorder %v956_v13, 32  ;;  %vm347_vm7 = vcmp.eq.s32.totalorder %v973_v35, 192  ;;  %vm193_vm8 = vcmp.eq.s32.totalorder %v956_v13, 48 }
  0x26   :  { %846 = vmatprep.subr.bf16.mxu1 %v845_v22  ;;  %v63_v61 = vadd.f32 %v62_v51, %v61_v41  ;;  %v526_v14 = vld [vmem:[%s1342_s2 + $0x70] sm:$0xff]  ;;  %vm210_vm9 = vcmp.eq.s32.totalorder %v956_v13, 64  ;;  %vm227_vm10 = vcmp.eq.s32.totalorder %v956_v13, 80  ;;  %vm364_vm12 = vcmp.eq.s32.totalorder %v973_v35, 208 }
  0x27   :  { %225 = vmax.xlane.f32.xlu1 %v222_v39  ;;  %361 = vmax.xlane.f32.xlu0 %v359_v40  ;;  %v66_v39 = vsel %vm51_vm0, %v930_v1, 0.0  ;;  %v851_v40 = vpack.c.bf16 %v523_v37, %v522_v36  ;;  %v413_v1 = vld [vmem:[%s1341_s1 + $0x60] sm:$0xff]  ;;  %v859_v19 = vpack.c.bf16 %v527_v15, %v526_v14  ;;  %vm279_vm0 = vcmp.eq.s32.totalorder %v973_v35, 128 }
  0x28   :  { %816 = vmatpush3.bf16.msra.mxu0 %v815_v18  ;;  %v67_v47 = vrot.slane %v66_v39, 4  ;;  %v823_v52 = vpack.c.bf16 %v414_v49, %v413_v1  ;;  %v64_v55 = vrot.slane %v63_v61, 1  ;;  %vm244_vm13 = vcmp.eq.s32.totalorder %v956_v13, 96 }
  0x29   :  { %848 = vmatpush3.bf16.msra.mxu1 %v847_v23  ;;  %818 = vmatprep.subr.bf16.mxu0 %v817_v28  ;;  %vm381_vm14 = vcmp.eq.s32.totalorder %v973_v35, 224  ;;  %vm398_vm15 = vcmp.eq.s32.totalorder %v973_v35, 240  ;;  %vm261_vm1 = vcmp.eq.s32.totalorder %v956_v13, 112  ;;  %v616_v35 = vld [vmem:[%s1343_s3] sm:$0x1]  ;;  %s896_s3 = smov [#allocation4]  }
  0x2a   :  { %850 = vmatprep.subr.bf16.mxu1 %v849_v0  ;;  %v68_v62 = vadd.f32 %v67_v47, %v66_v39  ;;  %v65_v20 = vadd.f32 %v64_v55, %v63_v61  ;;  %s709_s12 = sshll.u32 %s896_s3, 4  ;;  %s710_s12 = int_to_ptr.vmem [resolvable:$true] %s709_s12 }
  0x2b   :  { %242 = vmax.xlane.f32.xlu1 %v239_v57  ;;  %378 = vmax.xlane.f32.xlu0 %v376_v58  ;;  %v76_v57 = vrot.slane %v75_v45, 2  ;;  %v55_v58 = vrot.slane %v54_v46, 2  ;;  %s870_s13 = scalar_lea.vmem %s710_s12, 32  ;;  %p875_p1 = scmp.lt.s32.totalorder %s710_s12, %s710_s12 }
  0x2c   :  { %820 = vmatpush3.bf16.msra.mxu0 %v819_v33  ;;  %v69_v10 = vrot.slane %v68_v62, 2  ;;  %p871_p0 = scmp.ne.s32.totalorder %s710_s12, %s870_s13  ;;  %p876_p2 = scmp.lt.s32.totalorder %s870_s13, %s870_s13 }
  0x2d   :  { %852 = vmatpush3.bf16.msra.mxu1 %v851_v40  ;;  %822 = vmatprep.subr.bf16.mxu0 %v821_v48  ;;  %v77_v3 = vadd.f32 %v76_v57, %v75_v45  ;;  %v56_v4 = vadd.f32 %v55_v58, %v54_v46 }
  0x2e   :  { %854 = vmatprep.subr.bf16.mxu1 %v853_v59  ;;  %v70_v21 = vadd.f32 %v69_v10, %v68_v62  ;;  %v894_v62 = vmov 0.0   ;;  %p877_p3 = por %p876_p2, %p875_p1 }
  0x2f   :  { %259 = vmax.xlane.f32.xlu1 %v256_v11  ;;  %395 = vmax.xlane.f32.xlu0 %v393_v12  ;;  %v827_v11 = vpack.c.bf16 %v416_v43, %v415_v8  ;;  %v543_v12 = vld [vmem:[%s1342_s2 + $0xf8] sm:$0xff]  ;;  %v78_v16 = vrot.slane %v77_v3, 1  ;;  %v57_v17 = vrot.slane %v56_v4, 1 }
  0x30   :  { %824 = vmatpush3.bf16.msra.mxu0 %v823_v52  ;;  %v857_v18 = vpack.c.bf16 %v543_v12, %v542_v9  ;;  %v71_v24 = vrot.slane %v70_v21, 1  ;;  %p878_p4 = pnand %p877_p3, %p871_p0 }
  0x31   :  { %856 = vmatpush3.bf16.msra.mxu1 %v855_v60  ;;  %826 = vmatprep.subr.bf16.mxu0 %v825_v5  ;;  %v79_v22 = vadd.f32 %v78_v16, %v77_v3  ;;  %v58_v23 = vadd.f32 %v57_v17, %v56_v4 }
  0x32   :  { %858 = vmatprep.subr.bf16.mxu1 %v857_v18  ;;  %v72_v26 = vadd.f32 %v71_v24, %v70_v21 }
  0x33   :  { %v438_v25 = vsel %vm129_vm5, %v79_v22, %v65_v20 }
  0x34   :  { %828 = vmatpush3.bf16.msra.mxu0 %v827_v11  ;;  %505 = vmatprep.mubr.f32.mxu0 %v438_v25  ;;  %v437_v27 = vsel %vm129_vm5, %v72_v26, %v58_v23  ;;  %vm142_vm5 = vcmp.eq.s32.totalorder %v956_v13, 0 }
  0x35   :  { %860 = vmatpush3.bf16.msra.mxu1 %v859_v19  ;;  %792 = vmatprep.subr.mxu0 %v894_v62 }
  0x37   :  { %506 = vmatmul.mubr.f32.vlgmr.msra.gmra.mrb[0].mxu0 %v437_v27 }
  0xa0   :  { %v158_v28 = vpop.xlane.xlu1 %157  ;;  %v141_v29 = vpop.xlane.xlu0 %140 }
  0xa1   :  { %v144_v0 = vsel %vm142_vm5, %v141_v29, 0.0  ;;  %vm701_vm5 = vcmask 123904  }
  0xa2   :  { %v161_v44 = vsel %vm159_vm4, %v158_v28, %v144_v0 }
  0xa4   :  { %v175_v30 = vpop.xlane.xlu1 %174  ;;  %v277_v31 = vpop.xlane.xlu0 %276 }
  0xa5   :  { %v281_v34 = vsel %vm279_vm0, %v277_v31, 0.0  ;;  %v178_v45 = vsel %vm176_vm6, %v175_v30, %v161_v44  ;;  %vm621_vm0 = vcmask 1040384  }
  0xa6   :  { %793 = vmatpush3.msk.msra.mxu0 %vm621_vm0, %v616_v35 }
  0xa8   :  { %v192_v32 = vpop.xlane.xlu1 %191  ;;  %v311_v6 = vpop.xlane.xlu0 %310 }
  0xa9   :  { %v195_v1 = vsel %vm193_vm8, %v192_v32, %v178_v45 }
  0xac   :  { %v209_v7 = vpop.xlane.xlu1 %208  ;;  %v328_v33 = vpop.xlane.xlu0 %327 }
  0xad   :  { %v212_v49 = vsel %vm210_vm9, %v209_v7, %v195_v1 }
  0xb0   :  { %v294_v36 = vpop.xlane.xlu1 %293  ;;  %v345_v37 = vpop.xlane.xlu0 %344 }
  0xb1   :  { %v298_v38 = vsel %vm296_vm11, %v294_v36, %v281_v34  ;;  %vm895_vm11 = vmmov 0  }
  0xb2   :  { %v315_v39 = vsel %vm313_vm2, %v311_v6, %v298_v38  ;;  %794 = vmatprep.mubr.msk.f32.mxu0 %vm895_vm11, %v894_v62  ;;  %vm617_vm2 = vcmask 7168  }
  0xb3   :  { %v332_v42 = vsel %vm330_vm3, %v328_v33, %v315_v39 }
  0xb4   :  { %v226_v40 = vpop.xlane.xlu1 %225  ;;  %v362_v41 = vpop.xlane.xlu0 %361  ;;  %v349_v46 = vsel %vm347_vm7, %v345_v37, %v332_v42 }
  0xb5   :  { %v229_v50 = vsel %vm227_vm10, %v226_v40, %v212_v49  ;;  %v366_v51 = vsel %vm364_vm12, %v362_v41, %v349_v46 }
  0xb8   :  { %v243_v47 = vpop.xlane.xlu1 %242  ;;  %v379_v48 = vpop.xlane.xlu0 %378 }
  0xb9   :  { %v246_v52 = vsel %vm244_vm13, %v243_v47, %v229_v50  ;;  %v383_v53 = vsel %vm381_vm14, %v379_v48, %v366_v51 }
  0xbc   :  { %v260_v54 = vpop.xlane.xlu1 %259  ;;  %v396_v56 = vpop.xlane.xlu0 %395 }
  0xbd   :  { %v400_v57 = vsel %vm398_vm15, %v396_v56, %v383_v53  ;;  %v263_v58 = vsel %vm261_vm1, %v260_v54, %v246_v52 }
  0xbe   :  { %608 = vmatprep.mubr.f32.mxu1 %v400_v57 }
  0xbf   :  { %609 = vmatmul.mubr.f32.vlgmr.msra.gmra.mrb[0].mxu1 %v263_v58 }
 0x10a   :  { %v752_v59 = vpop.f32.mrb[0].mxu0 }
 0x10b   :  { %v753_v60 = vpop.f32.mrb[1].mxu0 }
 0x10c   :  { %v754_v61 = vadd.f32 %v753_v60, %v752_v59 }
 0x10e   :  { %v511_v2 = vmax.f32 %v754_v61, 0.0 }
 0x192   :  { %v787_v13 = vpop.f32.mrb[0].mxu1 }
 0x193   :  { %v788_v63 = vpop.f32.mrb[1].mxu1 }
 0x194   :  { %v789_v3 = vadd.f32 %v788_v63, %v787_v13 }
 0x196   :  { %v614_v4 = vmax.f32 %v789_v3, 0.0 }
 0x198   :  { %v615_v5 = vadd.f32 %v614_v4, %v511_v2 }
 0x19a   :  { %795 = vmatmul.mubr.msk.f32.vlgmr.msra.gmra.mrb[2].mxu0 %vm617_vm2, %v615_v5 }
 0x26d   :  { %v691_v8 = vpop.f32.mrb[2].mxu0 }
 0x26e   :  { %v719_v43 = vmul.f32 -1.442695, %v691_v8  ;;  %v796_v9 = vpop.f32.mrb[3].mxu0 }
 0x270   :  { %866 = vpow2.f32 %v719_v43 }
 0x27a   :  { %v867_v55 = vpop.eup %866 }
 0x27b   :  { %v698_v10 = vadd.f32 1.0, %v867_v55 }
 0x27d   :  { %868 = vrcp.f32 %v698_v10 }
 0x287   :  { %v869_v11 = vpop.eup %868 }
 0x288   :  { %702 = vst.msk [vmem:[#allocation4] sm:$0x3] %vm701_vm5, %v869_v11 }
 0x289   :  { %881 = shalt.err (!%p878_p4)
}
 0x28a   :  { %s882_s16 = scalar_lea.hbm %s1344_s4, 32 }
 0x28b   :  { %p883_p5 = scmp.ne.s32.totalorder %s1344_s4, %s882_s16  ;;  %p886_p6 = scmp.lt.u32.totalorder %s882_s16, %s1344_s4 }
 0x28d   :  { %p888_p7 = pnand %p886_p6, %p883_p5 }
 0x28f   :  { %891 = shalt.err (!%p888_p7)
}
 0x290   :  { %712 = dma.vmem_to_hbm [thread:$0]  %s710_s12, 32, %s1344_s4, [#allocation5]  }
 0x291   :  { %892 = dma.done.wait [#allocation5], 32  }
 0x292   :  { %893 = vsyncadd [#allocation5], 4294967264 }
 0x293   :  { %716 = vsyncpa [#allocation5], 1 }

</bundles_post_ra>
